<compile_context>
chip_gen: v5e
topology: v5e:2x2
jax: 0.10.0
libtpu: 0.0.40
codegen_flags: <defaults>
</compile_context>

<pallas_src>
import jax
import jax.numpy as jnp
from jax.experimental import pallas as pl
from jax.experimental.pallas import tpu as pltpu


def conv_bn_hardswish(x, w, gamma, beta, mean, var, eps=1e-5):
    """x: (N, Cin, H, W) f32; w: (Cout, Cin, 3, 3) f32 (torch OIHW). Returns NCHW f32."""
    N, Cin, H, W = x.shape
    Cout = w.shape[0]
    HW = H * W
    HWP = HW + 2 * W + 2  # halo: one padded row above/below + 1 extra element each end

    # ---- fold BN (inference) into conv weight + bias (tiny wrapper-side ops) ----
    scale = gamma / jnp.sqrt(var + eps)                        # (Cout,)
    w_folded = w * scale[:, None, None, None]                  # (Cout, Cin, 3, 3)
    w_taps = jnp.transpose(w_folded, (2, 3, 0, 1)).reshape(9, Cout, Cin)  # tap-major
    bias = (beta - mean * scale).reshape(Cout, 1)

    # ---- flatten spatial (free, contiguous) + single halo-pad pass ----
    xf = jnp.pad(x.reshape(N, Cin, HW), ((0, 0), (0, 0), (W + 1, W + 1)))  # (N, Cin, HWP)

    def kernel(xf_ref, w_ref, b_ref, o_ref):
        # xf_ref: (Cin, HWP)  w_ref: (9, Cout, Cin)  b_ref: (Cout, 1)  o_ref: (Cout, HW)
        col = jax.lax.broadcasted_iota(jnp.int32, (1, HW), 1) % W
        mask_l = (col != 0).astype(jnp.float32)        # zero dx = -1 taps at w == 0
        mask_r = (col != W - 1).astype(jnp.float32)    # zero dx = +1 taps at w == W-1

        acc = [jnp.zeros((Cout, HW), jnp.float32) for _ in range(3)]  # per-dx accum
        for t in range(9):
            dy, dx = t // 3 - 1, t % 3 - 1
            start = (dy + 1) * W + (dx + 1)              # static, in-bounds slice
            patch = xf_ref[:, start:start + HW]          # (Cin, HW), lane-dense
            acc[dx + 1] = acc[dx + 1] + jnp.dot(
                w_ref[t], patch, preferred_element_type=jnp.float32)   # (Cout, HW)

        z = acc[1] + mask_l * acc[0] + mask_r * acc[2] + b_ref[...]
        # Hardswish: x * relu6(x + 3) / 6
        o_ref[...] = z * jnp.clip(z + 3.0, 0.0, 6.0) * (1.0 / 6.0)

    out_flat = pl.pallas_call(
        kernel,
        out_shape=jax.ShapeDtypeStruct((N, Cout, HW), jnp.float32),
        grid=(N,),
        in_specs=[
            pl.BlockSpec((None, Cin, HWP), lambda n: (n, 0, 0)),   # activations (batch-squeezed)
            pl.BlockSpec((9, Cout, Cin), lambda n: (0, 0, 0)),     # BN-folded conv taps
            pl.BlockSpec((Cout, 1), lambda n: (0, 0)),             # BN-folded bias
        ],
        out_specs=pl.BlockSpec((None, Cout, HW), lambda n: (n, 0, 0)),
        compiler_params=pltpu.CompilerParams(
            dimension_semantics=("parallel",),
            vmem_limit_bytes=32 * 1024 * 1024,
        ),
    )(xf, w_taps, bias)

    # free reshape back to NCHW (no transpose pass)
    return out_flat.reshape(N, Cout, H, W)


def reference(x, w, gamma, beta, mean, var, eps=1e-5):
    """Pure-JAX reference mirroring the PyTorch forward (BN in eval mode)."""
    N, Cin, H, W = x.shape
    Cout = w.shape[0]
    xp = jnp.pad(x, ((0, 0), (0, 0), (1, 1), (1, 1)))
    z = jnp.zeros((N, Cout, H, W), jnp.float32)
    for ky in range(3):
        for kx in range(3):
            patch = xp[:, :, ky:ky + H, kx:kx + W]               # (N, Cin, H, W)
            z = z + jnp.einsum("oc,nchw->nohw", w[:, :, ky, kx], patch,
                               precision=jax.lax.Precision.HIGHEST)
    scale = gamma / jnp.sqrt(var + eps)
    bias = beta - mean * scale
    z = z * scale[None, :, None, None] + bias[None, :, None, None]
    return z * jnp.clip(z + 3.0, 0.0, 6.0) / 6.0                 # Hardswish


if __name__ == "__main__":
    key = jax.random.PRNGKey(0)
    ks = jax.random.split(key, 6)

    N, Cin, Cout, H, W = 2, 8, 16, 16, 16

    x = jax.random.normal(ks[0], (N, Cin, H, W), jnp.float32)
    w = jax.random.normal(ks[1], (Cout, Cin, 3, 3), jnp.float32) * 0.1  # conv weight (OIHW)
    gamma = 1.0 + 0.1 * jax.random.normal(ks[2], (Cout,), jnp.float32)
    beta = 0.1 * jax.random.normal(ks[3], (Cout,), jnp.float32)
    mean = 0.1 * jax.random.normal(ks[4], (Cout,), jnp.float32)
    var = jnp.abs(1.0 + 0.1 * jax.random.normal(ks[5], (Cout,), jnp.float32))

    out = conv_bn_hardswish(x, w, gamma, beta, mean, var)
    out = jax.block_until_ready(out)

    ref = reference(x, w, gamma, beta, mean, var)
    assert out.shape == (N, Cout, H, W)
    err = float(jnp.max(jnp.abs(out - ref)))
    assert jnp.allclose(out, ref, atol=1e-4, rtol=1e-4), f"mismatch vs reference (max abs err {err})"

    print("KERNEL_OK")
</pallas_src>

<mosaic_0001>
module attributes {stable_mosaic.version = 11 : i64} {
  func.func @kernel(%arg0: i32, %arg1: memref<1x8x290xf32, #tpu.memory_space<vmem>>, %arg2: memref<9x16x8xf32, #tpu.memory_space<vmem>>, %arg3: memref<16x1xf32, #tpu.memory_space<vmem>>, %arg4: memref<1x16x256xf32, #tpu.memory_space<vmem>>) attributes {dimension_semantics = [#tpu.dimension_semantics<parallel>], iteration_bounds = array<i64: 2>, scalar_prefetch = 0 : i64, scratch_operands = 0 : i64, tpu.core_type = #tpu.core_type<tc>, window_params = [{transform_indices = @transform_0, window_bounds = array<i64: 1, 8, 290>}, {pipeline_mode = #tpu.pipeline_mode<synchronous>, transform_indices = @transform_1, window_bounds = array<i64: 9, 16, 8>}, {pipeline_mode = #tpu.pipeline_mode<synchronous>, transform_indices = @transform_2, window_bounds = array<i64: 16, 1>}, {transform_indices = @transform_3, window_bounds = array<i64: 1, 16, 256>}]} {
    %0 = tpu.iota {dimensions = array<i32: 1>} : vector<1x256xi32>
    %c16_i32 = arith.constant 16 : i32
    %c0_i32 = arith.constant 0 : i32
    %1 = arith.cmpi eq, %c16_i32, %c0_i32 : i32
    %c1_i32 = arith.constant 1 : i32
    %2 = arith.select %1, %c1_i32, %c16_i32 : i32
    %3 = vector.broadcast %2 : i32 to vector<1x256xi32>
    %4 = arith.remsi %0, %3 : vector<1x256xi32>
    %c0_i32_0 = arith.constant 0 : i32
    %5 = vector.broadcast %c0_i32_0 : i32 to vector<1x256xi32>
    %6 = arith.cmpi ne, %4, %5 : vector<1x256xi32>
    %c0_i32_1 = arith.constant 0 : i32
    %7 = vector.broadcast %c0_i32_1 : i32 to vector<1x256xi32>
    %8 = arith.cmpi slt, %4, %7 : vector<1x256xi32>
    %c0_i32_2 = arith.constant 0 : i32
    %9 = arith.cmpi slt, %2, %c0_i32_2 : i32
    %10 = vector.broadcast %9 : i1 to vector<1x256xi1>
    %11 = vector.broadcast %10 : vector<1x256xi1> to vector<1x256xi1>
    %12 = arith.xori %8, %11 : vector<1x256xi1>
    %13 = arith.andi %12, %6 : vector<1x256xi1>
    %14 = vector.broadcast %2 : i32 to vector<1x256xi32>
    %15 = arith.addi %4, %14 : vector<1x256xi32>
    %16 = arith.select %13, %15, %4 : vector<1x256xi1>, vector<1x256xi32>
    %c0_i32_3 = arith.constant 0 : i32
    %17 = vector.broadcast %c0_i32_3 : i32 to vector<1x256xi32>
    %18 = arith.cmpi ne, %16, %17 : vector<1x256xi32>
    %19 = arith.extui %18 : vector<1x256xi1> to vector<1x256xi32>
    %20 = arith.sitofp %19 : vector<1x256xi32> to vector<1x256xf32>
    %c15_i32 = arith.constant 15 : i32
    %21 = vector.broadcast %c15_i32 : i32 to vector<1x256xi32>
    %22 = arith.cmpi ne, %16, %21 : vector<1x256xi32>
    %23 = arith.extui %22 : vector<1x256xi1> to vector<1x256xi32>
    %24 = arith.sitofp %23 : vector<1x256xi32> to vector<1x256xf32>
    %cst = arith.constant 0.000000e+00 : f32
    %25 = vector.broadcast %cst : f32 to vector<16x256xf32>
    %cst_4 = arith.constant 0.000000e+00 : f32
    %26 = vector.broadcast %cst_4 : f32 to vector<16x256xf32>
    %cst_5 = arith.constant 0.000000e+00 : f32
    %27 = vector.broadcast %cst_5 : f32 to vector<16x256xf32>
    %c0 = arith.constant 0 : index
    %c0_6 = arith.constant 0 : index
    %c0_7 = arith.constant 0 : index
    %28 = vector.load %arg1[%c0, %c0_6, %c0_7] : memref<1x8x290xf32, #tpu.memory_space<vmem>>, vector<1x8x256xf32>
    %29 = vector.shape_cast %28 : vector<1x8x256xf32> to vector<8x256xf32>
    %c0_8 = arith.constant 0 : index
    %c0_9 = arith.constant 0 : index
    %c0_10 = arith.constant 0 : index
    %30 = vector.load %arg2[%c0_8, %c0_9, %c0_10] : memref<9x16x8xf32, #tpu.memory_space<vmem>>, vector<1x16x8xf32>
    %31 = vector.shape_cast %30 : vector<1x16x8xf32> to vector<16x8xf32>
    %cst_11 = arith.constant dense<0.000000e+00> : vector<16x256xf32>
    %32 = tpu.matmul %31, %29, %cst_11 {dimension_numbers = #tpu.dot_dimension_numbers<[1], [0], [0], [1], [0, 0, 1, 1], [], []>} : vector<16x8xf32>, vector<8x256xf32>, vector<16x256xf32> -> vector<16x256xf32>
    %33 = arith.addf %25, %32 : vector<16x256xf32>
    %c0_12 = arith.constant 0 : index
    %c0_13 = arith.constant 0 : index
    %c1 = arith.constant 1 : index
    %34 = vector.load %arg1[%c0_12, %c0_13, %c1] : memref<1x8x290xf32, #tpu.memory_space<vmem>>, vector<1x8x256xf32>
    %35 = vector.shape_cast %34 : vector<1x8x256xf32> to vector<8x256xf32>
    %c1_14 = arith.constant 1 : index
    %c0_15 = arith.constant 0 : index
    %c0_16 = arith.constant 0 : index
    %36 = vector.load %arg2[%c1_14, %c0_15, %c0_16] : memref<9x16x8xf32, #tpu.memory_space<vmem>>, vector<1x16x8xf32>
    %37 = vector.shape_cast %36 : vector<1x16x8xf32> to vector<16x8xf32>
    %cst_17 = arith.constant dense<0.000000e+00> : vector<16x256xf32>
    %38 = tpu.matmul %37, %35, %cst_17 {dimension_numbers = #tpu.dot_dimension_numbers<[1], [0], [0], [1], [0, 0, 1, 1], [], []>} : vector<16x8xf32>, vector<8x256xf32>, vector<16x256xf32> -> vector<16x256xf32>
    %39 = arith.addf %26, %38 : vector<16x256xf32>
    %c0_18 = arith.constant 0 : index
    %c0_19 = arith.constant 0 : index
    %c2 = arith.constant 2 : index
    %40 = vector.load %arg1[%c0_18, %c0_19, %c2] : memref<1x8x290xf32, #tpu.memory_space<vmem>>, vector<1x8x256xf32>
    %41 = vector.shape_cast %40 : vector<1x8x256xf32> to vector<8x256xf32>
    %c2_20 = arith.constant 2 : index
    %c0_21 = arith.constant 0 : index
    %c0_22 = arith.constant 0 : index
    %42 = vector.load %arg2[%c2_20, %c0_21, %c0_22] : memref<9x16x8xf32, #tpu.memory_space<vmem>>, vector<1x16x8xf32>
    %43 = vector.shape_cast %42 : vector<1x16x8xf32> to vector<16x8xf32>
    %cst_23 = arith.constant dense<0.000000e+00> : vector<16x256xf32>
    %44 = tpu.matmul %43, %41, %cst_23 {dimension_numbers = #tpu.dot_dimension_numbers<[1], [0], [0], [1], [0, 0, 1, 1], [], []>} : vector<16x8xf32>, vector<8x256xf32>, vector<16x256xf32> -> vector<16x256xf32>
    %45 = arith.addf %27, %44 : vector<16x256xf32>
    %c0_24 = arith.constant 0 : index
    %c0_25 = arith.constant 0 : index
    %c16 = arith.constant 16 : index
    %46 = vector.load %arg1[%c0_24, %c0_25, %c16] : memref<1x8x290xf32, #tpu.memory_space<vmem>>, vector<1x8x256xf32>
    %47 = vector.shape_cast %46 : vector<1x8x256xf32> to vector<8x256xf32>
    %c3 = arith.constant 3 : index
    %c0_26 = arith.constant 0 : index
    %c0_27 = arith.constant 0 : index
    %48 = vector.load %arg2[%c3, %c0_26, %c0_27] : memref<9x16x8xf32, #tpu.memory_space<vmem>>, vector<1x16x8xf32>
    %49 = vector.shape_cast %48 : vector<1x16x8xf32> to vector<16x8xf32>
    %cst_28 = arith.constant dense<0.000000e+00> : vector<16x256xf32>
    %50 = tpu.matmul %49, %47, %cst_28 {dimension_numbers = #tpu.dot_dimension_numbers<[1], [0], [0], [1], [0, 0, 1, 1], [], []>} : vector<16x8xf32>, vector<8x256xf32>, vector<16x256xf32> -> vector<16x256xf32>
    %51 = arith.addf %33, %50 : vector<16x256xf32>
    %c0_29 = arith.constant 0 : index
    %c0_30 = arith.constant 0 : index
    %c17 = arith.constant 17 : index
    %52 = vector.load %arg1[%c0_29, %c0_30, %c17] : memref<1x8x290xf32, #tpu.memory_space<vmem>>, vector<1x8x256xf32>
    %53 = vector.shape_cast %52 : vector<1x8x256xf32> to vector<8x256xf32>
    %c4 = arith.constant 4 : index
    %c0_31 = arith.constant 0 : index
    %c0_32 = arith.constant 0 : index
    %54 = vector.load %arg2[%c4, %c0_31, %c0_32] : memref<9x16x8xf32, #tpu.memory_space<vmem>>, vector<1x16x8xf32>
    %55 = vector.shape_cast %54 : vector<1x16x8xf32> to vector<16x8xf32>
    %cst_33 = arith.constant dense<0.000000e+00> : vector<16x256xf32>
    %56 = tpu.matmul %55, %53, %cst_33 {dimension_numbers = #tpu.dot_dimension_numbers<[1], [0], [0], [1], [0, 0, 1, 1], [], []>} : vector<16x8xf32>, vector<8x256xf32>, vector<16x256xf32> -> vector<16x256xf32>
    %57 = arith.addf %39, %56 : vector<16x256xf32>
    %c0_34 = arith.constant 0 : index
    %c0_35 = arith.constant 0 : index
    %c18 = arith.constant 18 : index
    %58 = vector.load %arg1[%c0_34, %c0_35, %c18] : memref<1x8x290xf32, #tpu.memory_space<vmem>>, vector<1x8x256xf32>
    %59 = vector.shape_cast %58 : vector<1x8x256xf32> to vector<8x256xf32>
    %c5 = arith.constant 5 : index
    %c0_36 = arith.constant 0 : index
    %c0_37 = arith.constant 0 : index
    %60 = vector.load %arg2[%c5, %c0_36, %c0_37] : memref<9x16x8xf32, #tpu.memory_space<vmem>>, vector<1x16x8xf32>
    %61 = vector.shape_cast %60 : vector<1x16x8xf32> to vector<16x8xf32>
    %cst_38 = arith.constant dense<0.000000e+00> : vector<16x256xf32>
    %62 = tpu.matmul %61, %59, %cst_38 {dimension_numbers = #tpu.dot_dimension_numbers<[1], [0], [0], [1], [0, 0, 1, 1], [], []>} : vector<16x8xf32>, vector<8x256xf32>, vector<16x256xf32> -> vector<16x256xf32>
    %63 = arith.addf %45, %62 : vector<16x256xf32>
    %c0_39 = arith.constant 0 : index
    %c0_40 = arith.constant 0 : index
    %c32 = arith.constant 32 : index
    %64 = vector.load %arg1[%c0_39, %c0_40, %c32] : memref<1x8x290xf32, #tpu.memory_space<vmem>>, vector<1x8x256xf32>
    %65 = vector.shape_cast %64 : vector<1x8x256xf32> to vector<8x256xf32>
    %c6 = arith.constant 6 : index
    %c0_41 = arith.constant 0 : index
    %c0_42 = arith.constant 0 : index
    %66 = vector.load %arg2[%c6, %c0_41, %c0_42] : memref<9x16x8xf32, #tpu.memory_space<vmem>>, vector<1x16x8xf32>
    %67 = vector.shape_cast %66 : vector<1x16x8xf32> to vector<16x8xf32>
    %cst_43 = arith.constant dense<0.000000e+00> : vector<16x256xf32>
    %68 = tpu.matmul %67, %65, %cst_43 {dimension_numbers = #tpu.dot_dimension_numbers<[1], [0], [0], [1], [0, 0, 1, 1], [], []>} : vector<16x8xf32>, vector<8x256xf32>, vector<16x256xf32> -> vector<16x256xf32>
    %69 = arith.addf %51, %68 : vector<16x256xf32>
    %c0_44 = arith.constant 0 : index
    %c0_45 = arith.constant 0 : index
    %c33 = arith.constant 33 : index
    %70 = vector.load %arg1[%c0_44, %c0_45, %c33] : memref<1x8x290xf32, #tpu.memory_space<vmem>>, vector<1x8x256xf32>
    %71 = vector.shape_cast %70 : vector<1x8x256xf32> to vector<8x256xf32>
    %c7 = arith.constant 7 : index
    %c0_46 = arith.constant 0 : index
    %c0_47 = arith.constant 0 : index
    %72 = vector.load %arg2[%c7, %c0_46, %c0_47] : memref<9x16x8xf32, #tpu.memory_space<vmem>>, vector<1x16x8xf32>
    %73 = vector.shape_cast %72 : vector<1x16x8xf32> to vector<16x8xf32>
    %cst_48 = arith.constant dense<0.000000e+00> : vector<16x256xf32>
    %74 = tpu.matmul %73, %71, %cst_48 {dimension_numbers = #tpu.dot_dimension_numbers<[1], [0], [0], [1], [0, 0, 1, 1], [], []>} : vector<16x8xf32>, vector<8x256xf32>, vector<16x256xf32> -> vector<16x256xf32>
    %75 = arith.addf %57, %74 : vector<16x256xf32>
    %c0_49 = arith.constant 0 : index
    %c0_50 = arith.constant 0 : index
    %c34 = arith.constant 34 : index
    %76 = vector.load %arg1[%c0_49, %c0_50, %c34] : memref<1x8x290xf32, #tpu.memory_space<vmem>>, vector<1x8x256xf32>
    %77 = vector.shape_cast %76 : vector<1x8x256xf32> to vector<8x256xf32>
    %c8 = arith.constant 8 : index
    %c0_51 = arith.constant 0 : index
    %c0_52 = arith.constant 0 : index
    %78 = vector.load %arg2[%c8, %c0_51, %c0_52] : memref<9x16x8xf32, #tpu.memory_space<vmem>>, vector<1x16x8xf32>
    %79 = vector.shape_cast %78 : vector<1x16x8xf32> to vector<16x8xf32>
    %cst_53 = arith.constant dense<0.000000e+00> : vector<16x256xf32>
    %80 = tpu.matmul %79, %77, %cst_53 {dimension_numbers = #tpu.dot_dimension_numbers<[1], [0], [0], [1], [0, 0, 1, 1], [], []>} : vector<16x8xf32>, vector<8x256xf32>, vector<16x256xf32> -> vector<16x256xf32>
    %81 = arith.addf %63, %80 : vector<16x256xf32>
    %82 = vector.broadcast %20 : vector<1x256xf32> to vector<16x256xf32>
    %83 = arith.mulf %82, %69 : vector<16x256xf32>
    %84 = arith.addf %75, %83 : vector<16x256xf32>
    %85 = vector.broadcast %24 : vector<1x256xf32> to vector<16x256xf32>
    %86 = arith.mulf %85, %81 : vector<16x256xf32>
    %87 = arith.addf %84, %86 : vector<16x256xf32>
    %c0_54 = arith.constant 0 : index
    %c0_55 = arith.constant 0 : index
    %88 = vector.load %arg3[%c0_54, %c0_55] : memref<16x1xf32, #tpu.memory_space<vmem>>, vector<16x1xf32>
    %89 = vector.broadcast %88 : vector<16x1xf32> to vector<16x256xf32>
    %90 = arith.addf %87, %89 : vector<16x256xf32>
    %cst_56 = arith.constant 3.000000e+00 : f32
    %91 = vector.broadcast %cst_56 : f32 to vector<16x256xf32>
    %92 = arith.addf %90, %91 : vector<16x256xf32>
    %cst_57 = arith.constant 0.000000e+00 : f32
    %cst_58 = arith.constant 6.000000e+00 : f32
    %93 = vector.broadcast %cst_57 : f32 to vector<16x256xf32>
    %94 = arith.maximumf %93, %92 : vector<16x256xf32>
    %95 = vector.broadcast %cst_58 : f32 to vector<16x256xf32>
    %96 = arith.minimumf %95, %94 : vector<16x256xf32>
    %97 = arith.mulf %90, %96 : vector<16x256xf32>
    %cst_59 = arith.constant 0.166666672 : f32
    %98 = vector.broadcast %cst_59 : f32 to vector<16x256xf32>
    %99 = arith.mulf %97, %98 : vector<16x256xf32>
    %c0_60 = arith.constant 0 : index
    %c0_61 = arith.constant 0 : index
    %c0_62 = arith.constant 0 : index
    %100 = vector.load %arg4[%c0_60, %c0_61, %c0_62] : memref<1x16x256xf32, #tpu.memory_space<vmem>>, vector<1x16x256xf32>
    %101 = vector.shape_cast %100 : vector<1x16x256xf32> to vector<16x256xf32>
    %102 = vector.shape_cast %99 : vector<16x256xf32> to vector<1x16x256xf32>
    tpu.vector_store %arg4[%c0_60, %c0_61, %c0_62], %102 {strides = array<i32>} : memref<1x16x256xf32, #tpu.memory_space<vmem>>, vector<1x16x256xf32>,
    return
  }
  func.func @transform_0(%arg0: i32) -> (i32, i32, i32) {
    %c0_i32 = arith.constant 0 : i32
    %c0_i32_0 = arith.constant 0 : i32
    %c0_i32_1 = arith.constant 0 : i32
    return %arg0, %c0_i32, %c0_i32_0 : i32, i32, i32
  }
  func.func @transform_1(%arg0: i32) -> (i32, i32, i32) {
    %c0_i32 = arith.constant 0 : i32
    %c0_i32_0 = arith.constant 0 : i32
    %c0_i32_1 = arith.constant 0 : i32
    %c0_i32_2 = arith.constant 0 : i32
    return %c0_i32, %c0_i32_0, %c0_i32_1 : i32, i32, i32
  }
  func.func @transform_2(%arg0: i32) -> (i32, i32) {
    %c0_i32 = arith.constant 0 : i32
    %c0_i32_0 = arith.constant 0 : i32
    %c0_i32_1 = arith.constant 0 : i32
    return %c0_i32, %c0_i32_0 : i32, i32
  }
  func.func @transform_3(%arg0: i32) -> (i32, i32, i32) {
    %c0_i32 = arith.constant 0 : i32
    %c0_i32_0 = arith.constant 0 : i32
    %c0_i32_1 = arith.constant 0 : i32
    return %arg0, %c0_i32, %c0_i32_0 : i32, i32, i32
  }
}

</mosaic_0001>

<bundles_post_ra>
// kernel: tpu_custom_call.1
= control target key start
LH: loop header
LB: loop body
LE: loop exit
PB: predicated region body
PF: predicated region fallthrough
CT: control target
= control target key end

     0   :  { %8 = vsyncpa [#allocation3], 0  ;;  %s1416_s0 = inlined_call_operand.vmem [shape: f32[2,8,290], index: 0, kind: input, shape index: {}]   ;;  %s1417_s1 = inlined_call_operand.vmem [shape: f32[9,16,8], index: 1, kind: input, shape index: {}]   ;;  %s1418_s2 = inlined_call_operand.vmem [shape: f32[16,1], index: 2, kind: input, shape index: {}]   ;;  %s1419_s3 = inlined_call_operand.hbm [shape: f32[2,16,256], index: 3, kind: output, shape index: {}]  }
   0x1   :  { %10 = vsyncpa [#allocation3 + $0x1], 0  ;;  %s1204_s12 = smov 0   ;;  %s1206_s13 = smov 0  }
   0x2   :  { %s1208_s14 = smov 0   ;;  %s1210_s15 = smov 0  }
   0x3 LB: > { %s1225_s16 = sadd.s32 4294967295, %s1170_s15   ;;  %s943_s17 = sadd.s32 4294967294, %s1170_s15   ;;  %s1170_s15 = sphi %s1210_s15, %s1425_s15   ;;  %s1166_s14 = sphi %s1208_s14, %s1424_s14   ;;  %s1162_s13 = sphi %s1206_s13, %s1423_s13   ;;  %s1158_s12 = sphi %s1204_s12, %s1422_s12  }
   0x4   : > { %s1229_s18 = sadd.s32 1, %s1170_s15   ;;  %s91_s19 = sadd.s32 1, %s1166_s14 }
   0x5   : > { %s88_s20 = ssub.s32 %s1170_s15, %s1229_s18  ;;  %p101_p0 = scmp.ne.s32.totalorder %s1166_s14, %s1162_s13 }
   0x6   : > { %p89_p1 = scmp.eq.s32.totalorder %s88_s20, 0  ;;  %p102_p2 = scmp.eq.s32.totalorder %s1225_s16, 1 }
   0x7   : > { %p107_p3 = scmp.ne.s32.totalorder %s1162_s13, %s1158_s12  ;;  %p108_p4 = scmp.eq.s32.totalorder %s943_s17, 1 }
   0x8   : > { %s1240_s21 = scalar_select %p89_p1, %s1166_s14, %s91_s19  }
   0x9   : > { %p1242_p5 = por %p102_p2, %p101_p0  ;;  %p1246_p6 = por %p108_p4, %p107_p3 }
   0xa   : > { %p946_p7 = scmp.ge.s32.totalorder %s1170_s15, 1  ;;  %p140_p8 = scmp.lt.s32.totalorder %s1170_s15, 3 }
   0xc   : > { %p141_p9 = pnand %p946_p7, %p140_p8 }
   0xd   : > { %p164_p10 = scmp.lt.s32.totalorder (!%p141_p9), %s1225_s16, 1  ;;  %s1172_s29 = smov (!%p141_p9), 112  }
   0xe   : > { %144 = sbr.rel (%p141_p9) target bundleno = 370 (0x172), region = 32  ;;  %s1173_s30 = smov (!%p141_p9), 111  }
   0xf   : > { %s1174_s4 = smov (!%p141_p9), 127   ;;  %s1175_s5 = smov (!%p141_p9), 110  }
  0x10   : > { %s1176_s6 = smov (!%p141_p9), 126   ;;  %s1177_s7 = smov (!%p141_p9), 96  }
  0x11   : > { %s1178_s8 = smov (!%p141_p9), 95   ;;  %s1179_s9 = smov (!%p141_p9), 94  }
  0x12   : > { %s161_s20 = sand.u32 (!%p141_p9), 1, %s1162_s13   ;;  %s1010_s26 = sshll.u32 (!%p141_p9), %s1225_s16, 5 }
  0x13   : > { %s165_s24 = scalar_select %p164_p10, %s1225_s16, 1  ;;  %vm231_vm0 = vcmask 916480   ;;  %vm413_vm1 = vcmask 1039360   ;;  %vm350_vm2 = vcmask 908288   ;;  %v957_v15 = vld [vmem:[%s1417_s1 + $0x30] sm:$0xff]  ;;  %vm236_vm3 = vcmask 64512  }
  0x14   : > { %v958_v16 = vld [vmem:[%s1417_s1 + $0x38] sm:$0xff]  ;;  %vm542_vm4 = vcmask 1031168   ;;  %v210_v26 = vld [vmem:[%s1417_s1] sm:$0xff]  ;;  %vm479_vm5 = vcmask 900096   ;;  %v211_v35 = vld [vmem:[%s1417_s1 + $0x8] sm:$0xff]  ;;  %vm608_vm6 = vcmask 785408  }
  0x15   : > { %s1013_s25 = smul.u32 24, %s165_s24  ;;  %v967_v27 = vld [vmem:[%s1417_s1 + $0x40] sm:$0xff]  ;;  %v968_v36 = vld [vmem:[%s1417_s1 + $0x48] sm:$0xff]  ;;  %vm748_vm7 = vcmask 769024   ;;  %v953_v47 = vld [vmem:[%s1417_s1 + $0x10] sm:$0xff]  ;;  %vm678_vm8 = vcmask 777216  }
  0x16   : > { %v977_v48 = vld [vmem:[%s1417_s1 + $0x50] sm:$0xff]  ;;  %v954_v56 = vld [vmem:[%s1417_s1 + $0x18] sm:$0xff]  ;;  %v955_v62 = vld [vmem:[%s1417_s1 + $0x20] sm:$0xff]  ;;  %s947_s24 = sshll.u32 %s161_s20, 5  ;;  %s866_s16 = scalar_lea.sflag [#allocation3], %s161_s20 }
  0x17   : > { %s168_s28 = scalar_lea.vmem %s1416_s0, %s1013_s25  ;;  %v978_v57 = vld [vmem:[%s1417_s1 + $0x58] sm:$0xff]  ;;  %v987_v63 = vld [vmem:[%s1417_s1 + $0x60] sm:$0xff]  ;;  %s163_s25 = scalar_lea.vmem [#allocation2], %s947_s24 }
  0x18   : > { %v208_v0 = vld [vmem:[%s168_s28] sm:$0xff]  ;;  %v1257_v1 = vld [vmem:[%s168_s28 + $0x8] sm:$0xff]  ;;  %v212_v3 = vld [vmem:[%s168_s28 + $0x10] sm:$0xff] }
  0x19   : > { %v1065_v2 = vpack.i.bf16 %v1257_v1, %v208_v0 }
  0x1b   : > { %1066 = vrot.lane.b32.xlu0 %v1065_v2, %s1172_s29  ;;  %1071 = vrot.lane.b32.xlu1 %v1065_v2, %s1173_s30 }
  0x1c   : > { %1076 = vrot.lane.b32.xlu2 %v1065_v2, %s1174_s4 }
  0x23   : > { %229 = vrot.lane.b32.xlu0 %v212_v3, %s1172_s29  ;;  %348 = vrot.lane.b32.xlu1 %v212_v3, %s1173_s30  ;;  %s877_s29 = scalar_lea.hbm %s1419_s3, %s1010_s26  ;;  %s878_s30 = sshll.u32 %s163_s25, 4  ;;  %s879_s30 = int_to_ptr.vmem [resolvable:$true] %s878_s30 }
  0x24   : > { %411 = vrot.lane.b32.xlu2 %v212_v3, %s1174_s4  ;;  %s880_s4 = sshll.u32 %s877_s29, 4  ;;  %s881_s4 = int_to_ptr.hbm [resolvable:$true] %s880_s4 }
  0x2b   : > { %1081 = vrot.lane.b32.xlu0 %v1065_v2, %s1175_s5  ;;  %477 = vrot.lane.b32.xlu1 %v212_v3, %s1175_s5  ;;  %s1122_s5 = sshra.s32 %s881_s4, 4  ;;  %s1123_s5 = int_to_ptr.hbm [resolvable:$true] %s1122_s5 }
  0x2c   : > { %1086 = vrot.lane.b32.xlu2 %v1065_v2, %s1176_s6  ;;  %p1129_p0 = scmp.lt.s32.totalorder %s1123_s5, %s1419_s3 }
  0x33   : > { %540 = vrot.lane.b32.xlu0 %v212_v3, %s1176_s6  ;;  %1091 = vrot.lane.b32.xlu1 %v1065_v2, %s1177_s7  ;;  %s1124_s6 = scalar_lea.hbm %s1123_s5, 32 }
  0x34   : > { %606 = vrot.lane.b32.xlu2 %v212_v3, %s1177_s7  ;;  %p1125_p11 = scmp.ne.s32.totalorder %s1123_s5, %s1124_s6 }
  0x36   : > { %p1126_p12 = pnand %p1125_p11, %p1242_p5 }
  0x38   : > { %p1127_p13 = pneg %p1126_p12 }
  0x3b   : > { %1096 = vrot.lane.b32.xlu0 %v1065_v2, %s1178_s8  ;;  %676 = vrot.lane.b32.xlu1 %v212_v3, %s1178_s8 }
  0x3c   : > { %1101 = vrot.lane.b32.xlu2 %v1065_v2, %s1179_s9  ;;  %v1180_v2 = vmov 0  }
  0x3d   : > { %1105 = vset.pattern.permute.xlu1 %v1180_v2  ;;  %1106 = vset.pattern.permute.xlu2 %v1180_v2 }
  0x3e   : > { %1107 = vset.pattern.permute.xlu0 %v1180_v2 }
  0x43   : > { %746 = vrot.lane.b32.xlu0 %v212_v3, %s1179_s9  ;;  %v956_v3 = vld [vmem:[%s1417_s1 + $0x28] sm:$0xff]  ;;  %s1128_s9 = scalar_lea.hbm %s1419_s3, 64 }
  0x44   : > { %p1130_p1 = scmp.lt.s32.totalorder %s1128_s9, %s1124_s6 }
  0x46   : > { %p1131_p2 = por %p1130_p1, %p1129_p0 }
  0x48   : > { %p1132_p3 = pnand %p1131_p2, %p1127_p13 }
  0x76   : > { %v1077_v4 = vpop.permute.xlu2 %1076 }
  0x77   : > { %v1079_v9 = vunpack.i.h.bf16 %v1077_v4  ;;  %v1078_v10 = vunpack.i.l.bf16 %v1077_v4  ;;  %v988_v4 = vld [vmem:[%s1417_s1 + $0x68] sm:$0xff] }
  0x79   : > { %v414_v19 = vsel %vm413_vm1, %v1078_v10, %v1079_v9 }
  0x7e   : > { %v412_v5 = vpop.permute.xlu2 %411 }
  0x7f   : > { %v415_v29 = vsel %vm413_vm1, %v1079_v9, %v412_v5  ;;  %v993_v5 = vld [vmem:[%s1417_s1 + $0x70] sm:$0xff] }
  0x86   : > { %v1260_v6 = vpop.permute.xlu2 %1086 }
  0x87   : > { %v1089_v20 = vunpack.i.h.bf16 %v1260_v6  ;;  %v1088_v21 = vunpack.i.l.bf16 %v1260_v6  ;;  %v999_v6 = vld [vmem:[%s1417_s1 + $0x80] sm:$0xff] }
  0x89   : > { %v543_v30 = vsel %vm542_vm4, %v1088_v21, %v1089_v20 }
  0x8d   : > { %v1067_v7 = vpop.permute.xlu0 %1066  ;;  %v1072_v8 = vpop.permute.xlu1 %1071 }
  0x8e   : > { %v1069_v11 = vunpack.i.h.bf16 %v1067_v7  ;;  %v1068_v12 = vunpack.i.l.bf16 %v1067_v7  ;;  %v1074_v13 = vunpack.i.h.bf16 %v1072_v8  ;;  %v1073_v14 = vunpack.i.l.bf16 %v1072_v8  ;;  %v607_v28 = vpop.permute.xlu2 %606  ;;  %v994_v7 = vld [vmem:[%s1417_s1 + $0x78] sm:$0xff]  ;;  %v1000_v8 = vld [vmem:[%s1417_s1 + $0x88] sm:$0xff] }
  0x90   : > { %v232_v17 = vsel %vm231_vm0, %v1068_v12, %v1069_v11  ;;  %v351_v18 = vsel %vm350_vm2, %v1073_v14, %v1074_v13 }
  0x91   : > { %258 = vmatpush.msra.mxu0 %v232_v17  ;;  %1011 = vmatpush.msra.mxu2 %v232_v17 }
  0x92   : > { %959 = vmatmul.msk.f32.vlgmr.msra.gmra.mxu0 %vm236_vm3, %v957_v15  ;;  %960 = vmatmul.msk.f32.vlgmr.msra.gmra.mxu2 %vm236_vm3, %v958_v16 }
  0x93   : > { %310 = vmatpush.msrb.mxu2 %v208_v0  ;;  %376 = vmatpush.msrb.mxu0 %v351_v18  ;;  %v825_v0 = vld [vmem:[%s1418_s2] sm:$0xff] }
  0x94   : > { %829 = vperm.xlu1 %1105, %v825_v0  }
  0x95   : > { %439 = vmatpush.msra.mxu2 %v414_v19  ;;  %v230_v22 = vpop.permute.xlu0 %229  ;;  %v349_v23 = vpop.permute.xlu1 %348 }
  0x96   : > { %v233_v24 = vsel %vm231_vm0, %v1069_v11, %v230_v22  ;;  %v352_v25 = vsel %vm350_vm2, %v1074_v13, %v349_v23  ;;  %v1102_v39 = vpop.permute.xlu2 %1101 }
  0x97   : > { %281 = vmatpush.msra.mxu1 %v233_v24  ;;  %1012 = vmatpush.msra.mxu3 %v233_v24  ;;  %v1104_v40 = vunpack.i.h.bf16 %v1102_v39  ;;  %v1103_v41 = vunpack.i.l.bf16 %v1102_v39 }
  0x98   : > { %961 = vmatmul.msk.f32.vlgmr.msra.gmra.mxu1 %vm236_vm3, %v957_v15  ;;  %962 = vmatmul.msk.f32.vlgmr.msra.gmra.mxu3 %vm236_vm3, %v958_v16 }
  0x99   : > { %333 = vmatpush.msrb.mxu3 %v1257_v1  ;;  %399 = vmatpush.msrb.mxu1 %v352_v25  ;;  %v749_v51 = vsel %vm748_vm7, %v1103_v41, %v1104_v40  ;;  %v826_v1 = vld [vmem:[%s1418_s2 + $0x8] sm:$0xff] }
  0x9a   : > { %963 = vmatmul.msk.f32.vlgmr.msrb.gmra.mxu2 %vm236_vm3, %v210_v26  ;;  %969 = vmatmul.msk.f32.vlgmr.msrb.gmra.mxu0 %vm236_vm3, %v967_v27 }
  0x9b   : > { %462 = vmatpush.msra.mxu3 %v415_v29  ;;  %568 = vmatpush.msrb.mxu2 %v543_v30  ;;  %v169_v30 = vlaneseq }
  0x9c   : > { %834 = vperm.xlu2 %1106, %v826_v1  }
  0x9d   : > { %v1082_v31 = vpop.permute.xlu0 %1081  ;;  %v478_v32 = vpop.permute.xlu1 %477 }
  0x9e   : > { %v1084_v33 = vunpack.i.h.bf16 %v1082_v31  ;;  %v1083_v34 = vunpack.i.l.bf16 %v1082_v31 }
  0xa0   : > { %965 = vmatmul.msk.f32.vlgmr.msrb.gmra.mxu3 %vm236_vm3, %v210_v26  ;;  %971 = vmatmul.msk.f32.vlgmr.msrb.gmra.mxu1 %vm236_vm3, %v967_v27  ;;  %v481_v37 = vsel %vm479_vm5, %v1084_v33, %v478_v32  ;;  %v480_v38 = vsel %vm479_vm5, %v1083_v34, %v1084_v33  ;;  %v170_v34 = vand.u32 127, %v169_v30 }
  0xa1   : > { %505 = vmatpush.msra.mxu0 %v480_v38  ;;  %528 = vmatpush.msra.mxu1 %v481_v37 }
  0xa2   : > { %964 = vmatmul.msk.f32.gmra.mxu2 %vm236_vm3, %v211_v35  ;;  %970 = vmatmul.msk.f32.gmra.mxu0 %vm236_vm3, %v968_v36  ;;  %v171_v39 = vadd.s32 128, %v170_v34 }
  0xa5   : > { %v541_v42 = vpop.permute.xlu0 %540  ;;  %v1092_v43 = vpop.permute.xlu1 %1091 }
  0xa6   : > { %v544_v44 = vsel %vm542_vm4, %v1089_v20, %v541_v42  ;;  %v1094_v45 = vunpack.i.h.bf16 %v1092_v43  ;;  %v1093_v46 = vunpack.i.l.bf16 %v1092_v43 }
  0xa7   : > { %591 = vmatpush.msrb.mxu3 %v544_v44  ;;  %v183_v44 = vand.u32 15, %v171_v39 }
  0xa8   : > { %966 = vmatmul.msk.f32.gmra.mxu3 %vm236_vm3, %v211_v35  ;;  %972 = vmatmul.msk.f32.gmra.mxu1 %vm236_vm3, %v968_v36  ;;  %v610_v49 = vsel %vm608_vm6, %v1094_v45, %v607_v28  ;;  %v609_v50 = vsel %vm608_vm6, %v1093_v46, %v1094_v45  ;;  %v176_v36 = vand.u32 15, %v170_v34  ;;  %v1181_v45 = vmov 0.0  }
  0xa9   : > { %634 = vmatpush.msrb.mxu0 %v609_v50  ;;  %657 = vmatpush.msrb.mxu1 %v610_v49  ;;  %vm197_vm11 = vcmp.ne.s32.totalorder %v183_v44, 0  ;;  %vm203_vm12 = vcmp.ne.s32.totalorder %v183_v44, 15 }
  0xaa   : > { %973 = vmatmul.msk.f32.vlgmr.msra.gmra.mxu2 %vm236_vm3, %v953_v47  ;;  %979 = vmatmul.msk.f32.vlgmr.msra.gmra.mxu0 %vm236_vm3, %v977_v48  ;;  %vm196_vm9 = vcmp.ne.s32.totalorder %v176_v36, 0  ;;  %vm202_vm10 = vcmp.ne.s32.totalorder %v176_v36, 15 }
  0xab   : > { %774 = vmatpush.msra.mxu0 %v749_v51  ;;  %v949_v46 = vsel %vm196_vm9, 1.0, %v1181_v45  ;;  %v951_v50 = vsel %vm202_vm10, 1.0, %v1181_v45 }
  0xad   : > { %v1097_v52 = vpop.permute.xlu0 %1096  ;;  %v677_v53 = vpop.permute.xlu1 %676 }
  0xae   : > { %v1099_v54 = vunpack.i.h.bf16 %v1097_v52  ;;  %v1098_v55 = vunpack.i.l.bf16 %v1097_v52 }
  0xb0   : > { %975 = vmatmul.msk.f32.vlgmr.msra.gmra.mxu3 %vm236_vm3, %v953_v47  ;;  %981 = vmatmul.msk.f32.vlgmr.msra.gmra.mxu1 %vm236_vm3, %v977_v48  ;;  %v680_v58 = vsel %vm678_vm8, %v1099_v54, %v677_v53  ;;  %v679_v59 = vsel %vm678_vm8, %v1098_v55, %v1099_v54 }
  0xb1   : > { %704 = vmatpush.msra.mxu2 %v679_v59  ;;  %727 = vmatpush.msra.mxu3 %v680_v58 }
  0xb2   : > { %974 = vmatmul.msk.f32.gmra.mxu2 %vm236_vm3, %v954_v56  ;;  %980 = vmatmul.msk.f32.gmra.mxu0 %vm236_vm3, %v978_v57 }
  0xb5   : > { %v747_v60 = vpop.permute.xlu0 %746 }
  0xb6   : > { %v750_v61 = vsel %vm748_vm7, %v1104_v40, %v747_v60 }
  0xb7   : > { %797 = vmatpush.msra.mxu1 %v750_v61  ;;  %v950_v61 = vsel %vm197_vm11, 1.0, %v1181_v45 }
  0xb8   : > { %976 = vmatmul.msk.f32.gmra.mxu3 %vm236_vm3, %v954_v56  ;;  %982 = vmatmul.msk.f32.gmra.mxu1 %vm236_vm3, %v978_v57 }
  0xba   : > { %983 = vmatmul.msk.f32.vlgmr.msrb.gmra.mxu2 %vm236_vm3, %v955_v62  ;;  %989 = vmatmul.msk.f32.vlgmr.msrb.gmra.mxu0 %vm236_vm3, %v987_v63 }
  0xc0   : > { %985 = vmatmul.msk.f32.vlgmr.msrb.gmra.mxu3 %vm236_vm3, %v955_v62  ;;  %991 = vmatmul.msk.f32.vlgmr.msrb.gmra.mxu1 %vm236_vm3, %v987_v63 }
  0xc2   : > { %984 = vmatmul.msk.f32.gmra.mxu2 %vm236_vm3, %v956_v3  ;;  %990 = vmatmul.msk.f32.gmra.mxu0 %vm236_vm3, %v988_v4 }
  0xc8   : > { %986 = vmatmul.msk.f32.gmra.mxu3 %vm236_vm3, %v956_v3  ;;  %992 = vmatmul.msk.f32.gmra.mxu1 %vm236_vm3, %v988_v4 }
  0xca   : > { %995 = vmatmul.msk.f32.vlgmr.msra.gmra.mxu2 %vm236_vm3, %v993_v5  ;;  %1001 = vmatmul.msk.f32.vlgmr.msra.gmra.mxu0 %vm236_vm3, %v999_v6 }
  0xd0   : > { %997 = vmatmul.msk.f32.vlgmr.msra.gmra.mxu3 %vm236_vm3, %v993_v5  ;;  %1003 = vmatmul.msk.f32.vlgmr.msra.gmra.mxu1 %vm236_vm3, %v999_v6  ;;  %v952_v6 = vsel %vm203_vm12, 1.0, %v1181_v45 }
  0xd2   : > { %996 = vmatmul.msk.f32.gmra.mxu2 %vm236_vm3, %v994_v7  ;;  %1002 = vmatmul.msk.f32.gmra.mxu0 %vm236_vm3, %v1000_v8 }
  0xd8   : > { %998 = vmatmul.msk.f32.gmra.mxu3 %vm236_vm3, %v994_v7  ;;  %1004 = vmatmul.msk.f32.gmra.mxu1 %vm236_vm3, %v1000_v8 }
 0x106   : > { %v830_v0 = vpop.permute.xlu1 %829 }
 0x10f   : > { %v260_v9 = vpop.f32.mrf.mxu0 }
 0x115   : > { %v263_v10 = vpop.f32.mrf.mxu2  ;;  %v283_v11 = vpop.f32.mrf.mxu1 }
 0x117   : > { %v378_v12 = vpop.f32.mrf.mxu0 }
 0x11b   : > { %v1371_v13 = vpop.f32.mrf.mxu3 }
 0x11d   : > { %v312_v14 = vpop.f32.mrf.mxu2  ;;  %v401_v15 = vpop.f32.mrf.mxu1 }
 0x11e   : > { %v313_v41 = vadd.f32 %v312_v14, %v260_v9 }
 0x11f   : > { %v381_v16 = vpop.f32.mrf.mxu0 }
 0x123   : > { %v335_v17 = vpop.f32.mrf.mxu3 }
 0x124   : > { %v336_v53 = vadd.f32 %v335_v17, %v283_v11 }
 0x125   : > { %v315_v18 = vpop.f32.mrf.mxu2  ;;  %v1373_v19 = vpop.f32.mrf.mxu1 }
 0x126   : > { %v316_v56 = vadd.f32 %v315_v18, %v263_v10 }
 0x127   : > { %v507_v20 = vpop.f32.mrf.mxu0 }
 0x12b   : > { %v338_v21 = vpop.f32.mrf.mxu3 }
 0x12d   : > { %v441_v22 = vpop.f32.mrf.mxu2  ;;  %v530_v23 = vpop.f32.mrf.mxu1 }
 0x12e   : > { %v442_v48 = vadd.f32 %v441_v22, %v378_v12  ;;  %v339_v12 = vadd.f32 %v338_v21, %v1371_v13 }
 0x12f   : > { %v510_v24 = vpop.f32.mrf.mxu0 }
 0x133   : > { %v464_v25 = vpop.f32.mrf.mxu3 }
 0x134   : > { %v465_v1 = vadd.f32 %v464_v25, %v401_v15 }
 0x135   : > { %v444_v26 = vpop.f32.mrf.mxu2  ;;  %v533_v27 = vpop.f32.mrf.mxu1 }
 0x136   : > { %v445_v5 = vadd.f32 %v444_v26, %v381_v16 }
 0x137   : > { %v636_v28 = vpop.f32.mrf.mxu0 }
 0x138   : > { %v665_v42 = vadd.f32 %v636_v28, %v313_v41 }
 0x13a   : > { %v809_v54 = vmul.f32 %v949_v46, %v665_v42 }
 0x13b   : > { %v1375_v29 = vpop.f32.mrf.mxu3 }
 0x13c   : > { %v468_v13 = vadd.f32 %v1375_v29, %v1373_v19 }
 0x13d   : > { %v570_v31 = vpop.f32.mrf.mxu2  ;;  %v659_v32 = vpop.f32.mrf.mxu1 }
 0x13e   : > { %v571_v43 = vadd.f32 %v570_v31, %v507_v20  ;;  %v666_v57 = vadd.f32 %v659_v32, %v336_v53  ;;  %v835_v32 = vpop.permute.xlu2 %834 }
 0x13f   : > { %v639_v33 = vpop.f32.mrf.mxu0 }
 0x140   : > { %v667_v62 = vadd.f32 %v639_v33, %v316_v56  ;;  %v810_v8 = vmul.f32 %v950_v61, %v666_v57 }
 0x142   : > { %v811_v14 = vmul.f32 %v949_v46, %v667_v62 }
 0x143   : > { %v593_v35 = vpop.f32.mrf.mxu3 }
 0x144   : > { %v594_v58 = vadd.f32 %v593_v35, %v530_v23 }
 0x145   : > { %v573_v37 = vpop.f32.mrf.mxu2  ;;  %v662_v38 = vpop.f32.mrf.mxu1 }
 0x146   : > { %v574_v2 = vadd.f32 %v573_v37, %v510_v24  ;;  %v668_v24 = vadd.f32 %v662_v38, %v339_v12 }
 0x147   : > { %v776_v40 = vpop.f32.mrf.mxu0 }
 0x148   : > { %v805_v49 = vadd.f32 %v776_v40, %v571_v43  ;;  %v812_v35 = vmul.f32 %v950_v61, %v668_v24 }
 0x14a   : > { %v817_v59 = vmul.f32 %v951_v50, %v805_v49 }
 0x14b   : > { %v596_v47 = vpop.f32.mrf.mxu3 }
 0x14c   : > { %v597_v25 = vadd.f32 %v596_v47, %v533_v27 }
 0x14d   : > { %v706_v51 = vpop.f32.mrf.mxu2  ;;  %v799_v52 = vpop.f32.mrf.mxu1 }
 0x14e   : > { %v735_v55 = vadd.f32 %v706_v51, %v442_v48  ;;  %v806_v3 = vadd.f32 %v799_v52, %v594_v58 }
 0x14f   : > { %v779_v63 = vpop.f32.mrf.mxu0 }
 0x150   : > { %v813_v60 = vadd.f32 %v809_v54, %v735_v55  ;;  %v807_v9 = vadd.f32 %v779_v63, %v574_v2  ;;  %v818_v18 = vmul.f32 %v952_v6, %v806_v3 }
 0x152   : > { %v821_v4 = vadd.f32 %v817_v59, %v813_v60  ;;  %v819_v16 = vmul.f32 %v951_v50, %v807_v9 }
 0x153   : > { %v729_v7 = vpop.f32.mrf.mxu3 }
 0x154   : > { %v837_v10 = vadd.f32 %v830_v0, %v821_v4  ;;  %v736_v11 = vadd.f32 %v729_v7, %v465_v1 }
 0x155   : > { %v709_v17 = vpop.f32.mrf.mxu2  ;;  %v802_v23 = vpop.f32.mrf.mxu1 }
 0x156   : > { %v841_v20 = vadd.f32 3.0, %v837_v10  ;;  %v814_v22 = vadd.f32 %v810_v8, %v736_v11  ;;  %v737_v15 = vadd.f32 %v709_v17, %v445_v5  ;;  %v808_v31 = vadd.f32 %v802_v23, %v597_v25 }
 0x158   : > { %v845_v26 = vmax.f32 %v841_v20, 0.0  ;;  %v822_v28 = vadd.f32 %v818_v18, %v814_v22  ;;  %v815_v30 = vadd.f32 %v811_v14, %v737_v15  ;;  %v820_v40 = vmul.f32 %v952_v6, %v808_v31 }
 0x15a   : > { %v849_v21 = vmin.f32 %v845_v26, 6.0  ;;  %v838_v33 = vadd.f32 %v830_v0, %v822_v28  ;;  %v823_v34 = vadd.f32 %v819_v16, %v815_v30 }
 0x15b   : > { %v732_v36 = vpop.f32.mrf.mxu3 }
 0x15c   : > { %v853_v37 = vmul.f32 %v849_v21, %v837_v10  ;;  %v842_v38 = vadd.f32 3.0, %v838_v33  ;;  %v839_v27 = vadd.f32 %v835_v32, %v823_v34  ;;  %v738_v39 = vadd.f32 %v732_v36, %v468_v13 }
 0x15e   : > { %v857_v41 = vmul.f32 0.16666667, %v853_v37  ;;  %v846_v42 = vmax.f32 %v842_v38, 0.0  ;;  %v843_v43 = vadd.f32 3.0, %v839_v27  ;;  %v816_v44 = vadd.f32 %v812_v35, %v738_v39 }
 0x160   : > { %861 = vst [vmem:[%s163_s25] sm:$0xff] %v857_v41  ;;  %v850_v19 = vmin.f32 %v846_v42, 6.0  ;;  %v847_v29 = vmax.f32 %v843_v43, 0.0  ;;  %v824_v45 = vadd.f32 %v820_v40, %v816_v44 }
 0x162   : > { %v854_v46 = vmul.f32 %v850_v19, %v838_v33  ;;  %v851_v47 = vmin.f32 %v847_v29, 6.0  ;;  %v840_v48 = vadd.f32 %v835_v32, %v824_v45 }
 0x164   : > { %v858_v49 = vmul.f32 0.16666667, %v854_v46  ;;  %v855_v50 = vmul.f32 %v851_v47, %v839_v27  ;;  %v844_v51 = vadd.f32 3.0, %v840_v48 }
 0x166   : > { %862 = vst [vmem:[%s163_s25 + $0x8] sm:$0xff] %v858_v49  ;;  %v859_v52 = vmul.f32 0.16666667, %v855_v50  ;;  %v848_v53 = vmax.f32 %v844_v51, 0.0 }
 0x168   : > { %863 = vst [vmem:[%s163_s25 + $0x10] sm:$0xff] %v859_v52  ;;  %v852_v54 = vmin.f32 %v848_v53, 6.0 }
 0x16a   : > { %v856_v55 = vmul.f32 %v852_v54, %v840_v48 }
 0x16c   : > { %v860_v56 = vmul.f32 0.16666667, %v856_v55 }
 0x16e   : > { %864 = vst [vmem:[%s163_s25 + $0x18] sm:$0xff] %v860_v56 }
 0x16f   : > { %1135 = shalt.err (!%p1132_p3)
}
 0x170   : > { %s1182_s17 = smov 256   ;;  %s1183_s19 = smov 16  }
 0x171   : > { %1014 = dma.vmem_to_hbm [thread:$0]  (%p1242_p5), %s879_s30, 512, %s881_s4, %s866_s16, %s1182_s17, %s1182_s17, %s1183_s19  }
 0x172 PF: > { %p1020_p4 = scmp.ge.s32.totalorder %s1170_s15, 2  ;;  %s895_s20 = sand.u32 1, %s1158_s12  }
 0x173   : > { %s896_s24 = scalar_lea.sflag [#allocation3], %s895_s20 }
 0x174   : > { %p1017_p7 = pnand %p1020_p4, %p1246_p6 }
 0x176   : > { %p1018_p8 = pneg %p1017_p7 }
 0x178   : > { %1153 = dma.done.wait (%p1018_p8), %s896_s24, 512  }
 0x179   : > { %1155 = vsyncadd (%p1018_p8), %s896_s24, 4294966784  ;;  %p13_p9 = scmp.ge.s32.totalorder %s1229_s18, 4   ;;  %s1422_s12 = smov %s1162_s13 }
 0x17a   : > { %s1423_s13 = smov %s1166_s14  ;;  %s1424_s14 = smov %s1240_s21 }
 0x17b   : > { %s1425_s15 = smov %s1229_s18  ;;  %15 = sbr.rel (!%p13_p9) target bundleno = 3 (0x3), region = 75 }
 0x180   :  { %902 = vsyncpa [#allocation3], 1 }
 0x181   :  { %904 = vsyncpa [#allocation3 + $0x1], 1 }

</bundles_post_ra>
